<compile_context>
chip_gen: v7x
topology: tpu7x:2x2x1
jax: 0.10.0
libtpu: 0.0.40
codegen_flags: <defaults>
</compile_context>

<pallas_src>
import functools

import jax
import jax.numpy as jnp
from jax import lax
from jax.experimental import pallas as pl
from jax.experimental.pallas import tpu as pltpu


# Flat offsets into the packed parameter slab (PyTorch (out, in) row-major).
_W1, _B1 = 0, 15      # Linear(3 -> 5): 15 weights + 5 biases
_W2, _B2 = 20, 45     # Linear(5 -> 5): 25 weights + 5 biases
_W3, _B3 = 50, 75     # Linear(5 -> 5): 25 weights + 5 biases
_W4, _B4 = 80, 95     # Linear(5 -> 3): 15 weights + 3 biases
_N_PARAMS = 98


def _mlp_kernel(w_ref, x_ref, o_ref, *, ch, n_inner):
    """One batch tile of the 4-layer MLP.

    w_ref : SMEM f32[98]           packed weights + biases
    x_ref : VMEM f32[3, tc, 128]   features x (sublane chunks) x lanes
    o_ref : VMEM f32[3, tc, 128]
    ch, n_inner : static; tc == ch * n_inner
    """
    # Hoist all 98 SMEM scalar reads once (loop-invariant sregs).
    w = [w_ref[i] for i in range(_N_PARAMS)]

    def layer(rows, n_in, n_out, w_off, b_off, relu):
        # out_row[o] = sum_k w[o, k] * rows[k] + b[o]  (scalar-broadcast FMAs)
        outs = []
        for o in range(n_out):
            acc = w[w_off + o * n_in] * rows[0]
            for k in range(1, n_in):
                acc = acc + w[w_off + o * n_in + k] * rows[k]
            acc = acc + w[b_off + o]
            if relu:
                acc = jnp.maximum(acc, 0.0)
            outs.append(acc)
        return outs

    def chunk_body(i, carry):
        off = i * ch
        if not isinstance(off, int):
            off = pl.multiple_of(off, ch)          # aligned sublane offset
        rows = [x_ref[k, pl.ds(off, ch), :] for k in range(3)]   # (ch, 128)
        h = layer(rows, 3, 5, _W1, _B1, True)
        h = layer(h, 5, 5, _W2, _B2, True)
        h = layer(h, 5, 5, _W3, _B3, True)
        y = layer(h, 5, 3, _W4, _B4, False)
        for j in range(3):                          # full-width stores
            o_ref[j, pl.ds(off, ch), :] = y[j]
        return carry

    if n_inner == 1:
        chunk_body(0, 0)
    else:
        lax.fori_loop(0, n_inner, chunk_body, 0, unroll=2)


def pack_params(params):
    """Flatten all weights/biases (PyTorch convention) into one f32[98] slab."""
    flat = jnp.concatenate([
        params["w1"].reshape(-1), params["b1"].reshape(-1),
        params["w2"].reshape(-1), params["b2"].reshape(-1),
        params["w3"].reshape(-1), params["b3"].reshape(-1),
        params["w4"].reshape(-1), params["b4"].reshape(-1),
    ]).astype(jnp.float32)
    assert flat.shape == (_N_PARAMS,)
    return flat


def _round_up(n, m):
    return -(-n // m) * m


def dnn_forward_feature_major(xt, w_flat, *, max_tile_lanes=131072):
    """Zero-transpose entry point.

    xt     : (3, B) float32, feature-major (batch on the last / lane axis)
    w_flat : f32[98] packed parameter slab (see pack_params)
    returns (3, B) float32
    """
    _, B = xt.shape
    bp = _round_up(B, 128)
    if bp != B:                                    # <= 127 extra lanes only
        xt = jnp.pad(xt, ((0, 0), (0, bp - B)))
    chunks = bp // 128
    x3 = xt.reshape(3, chunks, 128)                # lane-dim split

    # ---- batch tile selection ----------------------------------------------
    max_tc = max(8, max_tile_lanes // 128)         # sublane-chunk rows / tile
    if chunks <= 8:
        tc = chunks                                # single tile == full extent
    else:
        # Aim for >= 2 tiles (lets the "parallel" axis shard over v7x's 2 TCs)
        # while capping the tile so double-buffered in+out VMEM stays a few MiB
        # (well under v7x's 64 MiB / default scoped-VMEM limits).
        tc = min(max_tc, _round_up(-(-chunks // 2), 8))
    grid = (-(-chunks // tc),)                     # partial last tile is OK

    # In-kernel sublane chunking keeps live vregs low (no spills).
    if tc % 16 == 0:
        ch = 16
    elif tc % 8 == 0:
        ch = 8
    else:
        ch = tc
    n_inner = tc // ch

    kernel = functools.partial(_mlp_kernel, ch=ch, n_inner=n_inner)
    out3 = pl.pallas_call(
        kernel,
        out_shape=jax.ShapeDtypeStruct((3, chunks, 128), jnp.float32),
        grid=grid,
        in_specs=[
            pl.BlockSpec(memory_space=pltpu.MemorySpace.SMEM),   # f32[98] slab
            pl.BlockSpec((3, tc, 128), lambda i: (0, i, 0)),     # x tile
        ],
        out_specs=pl.BlockSpec((3, tc, 128), lambda i: (0, i, 0)),
        compiler_params=pltpu.CompilerParams(
            dimension_semantics=("parallel",)),
    )(w_flat, x3)

    # Padded lanes of the last partial tile hold unspecified values; they are
    # sliced off here (no cross-lane reductions inside the kernel).
    return out3.reshape(3, bp)[:, :B]


def dnn_forward(x, params, *, max_tile_lanes=131072):
    """PyTorch-interface wrapper: x [B, 3] float32 -> [B, 3] float32.

    The two transposes exist only to match the nn.Module interface; callers
    that can keep activations feature-major should use
    dnn_forward_feature_major directly and skip both HBM passes.
    """
    w_flat = pack_params(params)
    xt = jnp.transpose(x).astype(jnp.float32)      # (3, B) feature-major
    yt = dnn_forward_feature_major(xt, w_flat, max_tile_lanes=max_tile_lanes)
    return jnp.transpose(yt)                       # (B, 3)


def init_params(key):
    """Deterministic init mirroring DNN.__init__ shapes (PyTorch convention:
    weight is (out_features, in_features), bias is (out_features,))."""
    ks = jax.random.split(key, 8)

    def lin(kw, kb, fan_in, fan_out):
        bound = 1.0 / jnp.sqrt(fan_in)
        w = jax.random.uniform(kw, (fan_out, fan_in), jnp.float32, -bound, bound)
        b = jax.random.uniform(kb, (fan_out,), jnp.float32, -bound, bound)
        return w, b

    w1, b1 = lin(ks[0], ks[1], 3, 5)
    w2, b2 = lin(ks[2], ks[3], 5, 5)
    w3, b3 = lin(ks[4], ks[5], 5, 5)
    w4, b4 = lin(ks[6], ks[7], 5, 3)
    return {"w1": w1, "b1": b1, "w2": w2, "b2": b2,
            "w3": w3, "b3": b3, "w4": w4, "b4": b4}


def reference_forward(x, p):
    """Pure-JAX reference for correctness checking."""
    h = jnp.maximum(x @ p["w1"].T + p["b1"], 0.0)
    h = jnp.maximum(h @ p["w2"].T + p["b2"], 0.0)
    h = jnp.maximum(h @ p["w3"].T + p["b3"], 0.0)
    return h @ p["w4"].T + p["b4"]


if __name__ == "__main__":
    key = jax.random.PRNGKey(0)
    k_x1, k_x2, k_p = jax.random.split(key, 3)
    params = init_params(k_p)

    # Small batch of rows, as in train_data[:, :3].
    x_small = jax.random.normal(k_x1, (8, 3), dtype=jnp.float32)
    out_small = jax.block_until_ready(dnn_forward(x_small, params))
    ref_small = reference_forward(x_small, params)
    assert out_small.shape == (8, 3)
    assert jnp.allclose(out_small, ref_small, atol=1e-5, rtol=1e-5)

    # Larger batch with a deliberately small tile cap to exercise the
    # multi-tile grid, the partial last tile and the in-kernel chunk loop.
    x_big = jax.random.normal(k_x2, (5000, 3), dtype=jnp.float32)
    out_big = jax.block_until_ready(
        dnn_forward(x_big, params, max_tile_lanes=4096))
    ref_big = reference_forward(x_big, params)
    assert out_big.shape == (5000, 3)
    assert jnp.allclose(out_big, ref_big, atol=1e-4, rtol=1e-4)

    print("KERNEL_OK")
</pallas_src>

<mosaic_0001>
module attributes {stable_mosaic.version = 11 : i64} {
  func.func @_mlp_kernel(%arg0: i32, %arg1: memref<98xf32, #tpu.memory_space<smem>>, %arg2: memref<3x1x128xf32, #tpu.memory_space<vmem>>, %arg3: memref<3x1x128xf32, #tpu.memory_space<vmem>>) attributes {dimension_semantics = [#tpu.dimension_semantics<parallel>], iteration_bounds = array<i64: 1>, scalar_prefetch = 0 : i64, scratch_operands = 0 : i64, tpu.core_type = #tpu.core_type<tc>, window_params = [{transform_indices = @transform_0, window_bounds = array<i64: 98>}, {transform_indices = @transform_1, window_bounds = array<i64: 3, 1, 128>}, {transform_indices = @transform_2, window_bounds = array<i64: 3, 1, 128>}]} {
    %c0 = arith.constant 0 : index
    %0 = memref.load %arg1[%c0] : memref<98xf32, #tpu.memory_space<smem>>
    %c1 = arith.constant 1 : index
    %1 = memref.load %arg1[%c1] : memref<98xf32, #tpu.memory_space<smem>>
    %c2 = arith.constant 2 : index
    %2 = memref.load %arg1[%c2] : memref<98xf32, #tpu.memory_space<smem>>
    %c3 = arith.constant 3 : index
    %3 = memref.load %arg1[%c3] : memref<98xf32, #tpu.memory_space<smem>>
    %c4 = arith.constant 4 : index
    %4 = memref.load %arg1[%c4] : memref<98xf32, #tpu.memory_space<smem>>
    %c5 = arith.constant 5 : index
    %5 = memref.load %arg1[%c5] : memref<98xf32, #tpu.memory_space<smem>>
    %c6 = arith.constant 6 : index
    %6 = memref.load %arg1[%c6] : memref<98xf32, #tpu.memory_space<smem>>
    %c7 = arith.constant 7 : index
    %7 = memref.load %arg1[%c7] : memref<98xf32, #tpu.memory_space<smem>>
    %c8 = arith.constant 8 : index
    %8 = memref.load %arg1[%c8] : memref<98xf32, #tpu.memory_space<smem>>
    %c9 = arith.constant 9 : index
    %9 = memref.load %arg1[%c9] : memref<98xf32, #tpu.memory_space<smem>>
    %c10 = arith.constant 10 : index
    %10 = memref.load %arg1[%c10] : memref<98xf32, #tpu.memory_space<smem>>
    %c11 = arith.constant 11 : index
    %11 = memref.load %arg1[%c11] : memref<98xf32, #tpu.memory_space<smem>>
    %c12 = arith.constant 12 : index
    %12 = memref.load %arg1[%c12] : memref<98xf32, #tpu.memory_space<smem>>
    %c13 = arith.constant 13 : index
    %13 = memref.load %arg1[%c13] : memref<98xf32, #tpu.memory_space<smem>>
    %c14 = arith.constant 14 : index
    %14 = memref.load %arg1[%c14] : memref<98xf32, #tpu.memory_space<smem>>
    %c15 = arith.constant 15 : index
    %15 = memref.load %arg1[%c15] : memref<98xf32, #tpu.memory_space<smem>>
    %c16 = arith.constant 16 : index
    %16 = memref.load %arg1[%c16] : memref<98xf32, #tpu.memory_space<smem>>
    %c17 = arith.constant 17 : index
    %17 = memref.load %arg1[%c17] : memref<98xf32, #tpu.memory_space<smem>>
    %c18 = arith.constant 18 : index
    %18 = memref.load %arg1[%c18] : memref<98xf32, #tpu.memory_space<smem>>
    %c19 = arith.constant 19 : index
    %19 = memref.load %arg1[%c19] : memref<98xf32, #tpu.memory_space<smem>>
    %c20 = arith.constant 20 : index
    %20 = memref.load %arg1[%c20] : memref<98xf32, #tpu.memory_space<smem>>
    %c21 = arith.constant 21 : index
    %21 = memref.load %arg1[%c21] : memref<98xf32, #tpu.memory_space<smem>>
    %c22 = arith.constant 22 : index
    %22 = memref.load %arg1[%c22] : memref<98xf32, #tpu.memory_space<smem>>
    %c23 = arith.constant 23 : index
    %23 = memref.load %arg1[%c23] : memref<98xf32, #tpu.memory_space<smem>>
    %c24 = arith.constant 24 : index
    %24 = memref.load %arg1[%c24] : memref<98xf32, #tpu.memory_space<smem>>
    %c25 = arith.constant 25 : index
    %25 = memref.load %arg1[%c25] : memref<98xf32, #tpu.memory_space<smem>>
    %c26 = arith.constant 26 : index
    %26 = memref.load %arg1[%c26] : memref<98xf32, #tpu.memory_space<smem>>
    %c27 = arith.constant 27 : index
    %27 = memref.load %arg1[%c27] : memref<98xf32, #tpu.memory_space<smem>>
    %c28 = arith.constant 28 : index
    %28 = memref.load %arg1[%c28] : memref<98xf32, #tpu.memory_space<smem>>
    %c29 = arith.constant 29 : index
    %29 = memref.load %arg1[%c29] : memref<98xf32, #tpu.memory_space<smem>>
    %c30 = arith.constant 30 : index
    %30 = memref.load %arg1[%c30] : memref<98xf32, #tpu.memory_space<smem>>
    %c31 = arith.constant 31 : index
    %31 = memref.load %arg1[%c31] : memref<98xf32, #tpu.memory_space<smem>>
    %c32 = arith.constant 32 : index
    %32 = memref.load %arg1[%c32] : memref<98xf32, #tpu.memory_space<smem>>
    %c33 = arith.constant 33 : index
    %33 = memref.load %arg1[%c33] : memref<98xf32, #tpu.memory_space<smem>>
    %c34 = arith.constant 34 : index
    %34 = memref.load %arg1[%c34] : memref<98xf32, #tpu.memory_space<smem>>
    %c35 = arith.constant 35 : index
    %35 = memref.load %arg1[%c35] : memref<98xf32, #tpu.memory_space<smem>>
    %c36 = arith.constant 36 : index
    %36 = memref.load %arg1[%c36] : memref<98xf32, #tpu.memory_space<smem>>
    %c37 = arith.constant 37 : index
    %37 = memref.load %arg1[%c37] : memref<98xf32, #tpu.memory_space<smem>>
    %c38 = arith.constant 38 : index
    %38 = memref.load %arg1[%c38] : memref<98xf32, #tpu.memory_space<smem>>
    %c39 = arith.constant 39 : index
    %39 = memref.load %arg1[%c39] : memref<98xf32, #tpu.memory_space<smem>>
    %c40 = arith.constant 40 : index
    %40 = memref.load %arg1[%c40] : memref<98xf32, #tpu.memory_space<smem>>
    %c41 = arith.constant 41 : index
    %41 = memref.load %arg1[%c41] : memref<98xf32, #tpu.memory_space<smem>>
    %c42 = arith.constant 42 : index
    %42 = memref.load %arg1[%c42] : memref<98xf32, #tpu.memory_space<smem>>
    %c43 = arith.constant 43 : index
    %43 = memref.load %arg1[%c43] : memref<98xf32, #tpu.memory_space<smem>>
    %c44 = arith.constant 44 : index
    %44 = memref.load %arg1[%c44] : memref<98xf32, #tpu.memory_space<smem>>
    %c45 = arith.constant 45 : index
    %45 = memref.load %arg1[%c45] : memref<98xf32, #tpu.memory_space<smem>>
    %c46 = arith.constant 46 : index
    %46 = memref.load %arg1[%c46] : memref<98xf32, #tpu.memory_space<smem>>
    %c47 = arith.constant 47 : index
    %47 = memref.load %arg1[%c47] : memref<98xf32, #tpu.memory_space<smem>>
    %c48 = arith.constant 48 : index
    %48 = memref.load %arg1[%c48] : memref<98xf32, #tpu.memory_space<smem>>
    %c49 = arith.constant 49 : index
    %49 = memref.load %arg1[%c49] : memref<98xf32, #tpu.memory_space<smem>>
    %c50 = arith.constant 50 : index
    %50 = memref.load %arg1[%c50] : memref<98xf32, #tpu.memory_space<smem>>
    %c51 = arith.constant 51 : index
    %51 = memref.load %arg1[%c51] : memref<98xf32, #tpu.memory_space<smem>>
    %c52 = arith.constant 52 : index
    %52 = memref.load %arg1[%c52] : memref<98xf32, #tpu.memory_space<smem>>
    %c53 = arith.constant 53 : index
    %53 = memref.load %arg1[%c53] : memref<98xf32, #tpu.memory_space<smem>>
    %c54 = arith.constant 54 : index
    %54 = memref.load %arg1[%c54] : memref<98xf32, #tpu.memory_space<smem>>
    %c55 = arith.constant 55 : index
    %55 = memref.load %arg1[%c55] : memref<98xf32, #tpu.memory_space<smem>>
    %c56 = arith.constant 56 : index
    %56 = memref.load %arg1[%c56] : memref<98xf32, #tpu.memory_space<smem>>
    %c57 = arith.constant 57 : index
    %57 = memref.load %arg1[%c57] : memref<98xf32, #tpu.memory_space<smem>>
    %c58 = arith.constant 58 : index
    %58 = memref.load %arg1[%c58] : memref<98xf32, #tpu.memory_space<smem>>
    %c59 = arith.constant 59 : index
    %59 = memref.load %arg1[%c59] : memref<98xf32, #tpu.memory_space<smem>>
    %c60 = arith.constant 60 : index
    %60 = memref.load %arg1[%c60] : memref<98xf32, #tpu.memory_space<smem>>
    %c61 = arith.constant 61 : index
    %61 = memref.load %arg1[%c61] : memref<98xf32, #tpu.memory_space<smem>>
    %c62 = arith.constant 62 : index
    %62 = memref.load %arg1[%c62] : memref<98xf32, #tpu.memory_space<smem>>
    %c63 = arith.constant 63 : index
    %63 = memref.load %arg1[%c63] : memref<98xf32, #tpu.memory_space<smem>>
    %c64 = arith.constant 64 : index
    %64 = memref.load %arg1[%c64] : memref<98xf32, #tpu.memory_space<smem>>
    %c65 = arith.constant 65 : index
    %65 = memref.load %arg1[%c65] : memref<98xf32, #tpu.memory_space<smem>>
    %c66 = arith.constant 66 : index
    %66 = memref.load %arg1[%c66] : memref<98xf32, #tpu.memory_space<smem>>
    %c67 = arith.constant 67 : index
    %67 = memref.load %arg1[%c67] : memref<98xf32, #tpu.memory_space<smem>>
    %c68 = arith.constant 68 : index
    %68 = memref.load %arg1[%c68] : memref<98xf32, #tpu.memory_space<smem>>
    %c69 = arith.constant 69 : index
    %69 = memref.load %arg1[%c69] : memref<98xf32, #tpu.memory_space<smem>>
    %c70 = arith.constant 70 : index
    %70 = memref.load %arg1[%c70] : memref<98xf32, #tpu.memory_space<smem>>
    %c71 = arith.constant 71 : index
    %71 = memref.load %arg1[%c71] : memref<98xf32, #tpu.memory_space<smem>>
    %c72 = arith.constant 72 : index
    %72 = memref.load %arg1[%c72] : memref<98xf32, #tpu.memory_space<smem>>
    %c73 = arith.constant 73 : index
    %73 = memref.load %arg1[%c73] : memref<98xf32, #tpu.memory_space<smem>>
    %c74 = arith.constant 74 : index
    %74 = memref.load %arg1[%c74] : memref<98xf32, #tpu.memory_space<smem>>
    %c75 = arith.constant 75 : index
    %75 = memref.load %arg1[%c75] : memref<98xf32, #tpu.memory_space<smem>>
    %c76 = arith.constant 76 : index
    %76 = memref.load %arg1[%c76] : memref<98xf32, #tpu.memory_space<smem>>
    %c77 = arith.constant 77 : index
    %77 = memref.load %arg1[%c77] : memref<98xf32, #tpu.memory_space<smem>>
    %c78 = arith.constant 78 : index
    %78 = memref.load %arg1[%c78] : memref<98xf32, #tpu.memory_space<smem>>
    %c79 = arith.constant 79 : index
    %79 = memref.load %arg1[%c79] : memref<98xf32, #tpu.memory_space<smem>>
    %c80 = arith.constant 80 : index
    %80 = memref.load %arg1[%c80] : memref<98xf32, #tpu.memory_space<smem>>
    %c81 = arith.constant 81 : index
    %81 = memref.load %arg1[%c81] : memref<98xf32, #tpu.memory_space<smem>>
    %c82 = arith.constant 82 : index
    %82 = memref.load %arg1[%c82] : memref<98xf32, #tpu.memory_space<smem>>
    %c83 = arith.constant 83 : index
    %83 = memref.load %arg1[%c83] : memref<98xf32, #tpu.memory_space<smem>>
    %c84 = arith.constant 84 : index
    %84 = memref.load %arg1[%c84] : memref<98xf32, #tpu.memory_space<smem>>
    %c85 = arith.constant 85 : index
    %85 = memref.load %arg1[%c85] : memref<98xf32, #tpu.memory_space<smem>>
    %c86 = arith.constant 86 : index
    %86 = memref.load %arg1[%c86] : memref<98xf32, #tpu.memory_space<smem>>
    %c87 = arith.constant 87 : index
    %87 = memref.load %arg1[%c87] : memref<98xf32, #tpu.memory_space<smem>>
    %c88 = arith.constant 88 : index
    %88 = memref.load %arg1[%c88] : memref<98xf32, #tpu.memory_space<smem>>
    %c89 = arith.constant 89 : index
    %89 = memref.load %arg1[%c89] : memref<98xf32, #tpu.memory_space<smem>>
    %c90 = arith.constant 90 : index
    %90 = memref.load %arg1[%c90] : memref<98xf32, #tpu.memory_space<smem>>
    %c91 = arith.constant 91 : index
    %91 = memref.load %arg1[%c91] : memref<98xf32, #tpu.memory_space<smem>>
    %c92 = arith.constant 92 : index
    %92 = memref.load %arg1[%c92] : memref<98xf32, #tpu.memory_space<smem>>
    %c93 = arith.constant 93 : index
    %93 = memref.load %arg1[%c93] : memref<98xf32, #tpu.memory_space<smem>>
    %c94 = arith.constant 94 : index
    %94 = memref.load %arg1[%c94] : memref<98xf32, #tpu.memory_space<smem>>
    %c95 = arith.constant 95 : index
    %95 = memref.load %arg1[%c95] : memref<98xf32, #tpu.memory_space<smem>>
    %c96 = arith.constant 96 : index
    %96 = memref.load %arg1[%c96] : memref<98xf32, #tpu.memory_space<smem>>
    %c97 = arith.constant 97 : index
    %97 = memref.load %arg1[%c97] : memref<98xf32, #tpu.memory_space<smem>>
    %c0_0 = arith.constant 0 : index
    %c0_1 = arith.constant 0 : index
    %c0_2 = arith.constant 0 : index
    %98 = vector.load %arg2[%c0_0, %c0_1, %c0_2] : memref<3x1x128xf32, #tpu.memory_space<vmem>>, vector<1x1x128xf32>
    %99 = vector.shape_cast %98 : vector<1x1x128xf32> to vector<1x128xf32>
    %c1_3 = arith.constant 1 : index
    %c0_4 = arith.constant 0 : index
    %c0_5 = arith.constant 0 : index
    %100 = vector.load %arg2[%c1_3, %c0_4, %c0_5] : memref<3x1x128xf32, #tpu.memory_space<vmem>>, vector<1x1x128xf32>
    %101 = vector.shape_cast %100 : vector<1x1x128xf32> to vector<1x128xf32>
    %c2_6 = arith.constant 2 : index
    %c0_7 = arith.constant 0 : index
    %c0_8 = arith.constant 0 : index
    %102 = vector.load %arg2[%c2_6, %c0_7, %c0_8] : memref<3x1x128xf32, #tpu.memory_space<vmem>>, vector<1x1x128xf32>
    %103 = vector.shape_cast %102 : vector<1x1x128xf32> to vector<1x128xf32>
    %104 = vector.broadcast %0 : f32 to vector<1x128xf32>
    %105 = arith.mulf %104, %99 : vector<1x128xf32>
    %106 = vector.broadcast %1 : f32 to vector<1x128xf32>
    %107 = arith.mulf %106, %101 : vector<1x128xf32>
    %108 = arith.addf %105, %107 : vector<1x128xf32>
    %109 = vector.broadcast %2 : f32 to vector<1x128xf32>
    %110 = arith.mulf %109, %103 : vector<1x128xf32>
    %111 = arith.addf %108, %110 : vector<1x128xf32>
    %112 = vector.broadcast %15 : f32 to vector<1x128xf32>
    %113 = arith.addf %111, %112 : vector<1x128xf32>
    %cst = arith.constant 0.000000e+00 : f32
    %114 = vector.broadcast %cst : f32 to vector<1x128xf32>
    %115 = arith.maximumf %113, %114 : vector<1x128xf32>
    %116 = vector.broadcast %3 : f32 to vector<1x128xf32>
    %117 = arith.mulf %116, %99 : vector<1x128xf32>
    %118 = vector.broadcast %4 : f32 to vector<1x128xf32>
    %119 = arith.mulf %118, %101 : vector<1x128xf32>
    %120 = arith.addf %117, %119 : vector<1x128xf32>
    %121 = vector.broadcast %5 : f32 to vector<1x128xf32>
    %122 = arith.mulf %121, %103 : vector<1x128xf32>
    %123 = arith.addf %120, %122 : vector<1x128xf32>
    %124 = vector.broadcast %16 : f32 to vector<1x128xf32>
    %125 = arith.addf %123, %124 : vector<1x128xf32>
    %cst_9 = arith.constant 0.000000e+00 : f32
    %126 = vector.broadcast %cst_9 : f32 to vector<1x128xf32>
    %127 = arith.maximumf %125, %126 : vector<1x128xf32>
    %128 = vector.broadcast %6 : f32 to vector<1x128xf32>
    %129 = arith.mulf %128, %99 : vector<1x128xf32>
    %130 = vector.broadcast %7 : f32 to vector<1x128xf32>
    %131 = arith.mulf %130, %101 : vector<1x128xf32>
    %132 = arith.addf %129, %131 : vector<1x128xf32>
    %133 = vector.broadcast %8 : f32 to vector<1x128xf32>
    %134 = arith.mulf %133, %103 : vector<1x128xf32>
    %135 = arith.addf %132, %134 : vector<1x128xf32>
    %136 = vector.broadcast %17 : f32 to vector<1x128xf32>
    %137 = arith.addf %135, %136 : vector<1x128xf32>
    %cst_10 = arith.constant 0.000000e+00 : f32
    %138 = vector.broadcast %cst_10 : f32 to vector<1x128xf32>
    %139 = arith.maximumf %137, %138 : vector<1x128xf32>
    %140 = vector.broadcast %9 : f32 to vector<1x128xf32>
    %141 = arith.mulf %140, %99 : vector<1x128xf32>
    %142 = vector.broadcast %10 : f32 to vector<1x128xf32>
    %143 = arith.mulf %142, %101 : vector<1x128xf32>
    %144 = arith.addf %141, %143 : vector<1x128xf32>
    %145 = vector.broadcast %11 : f32 to vector<1x128xf32>
    %146 = arith.mulf %145, %103 : vector<1x128xf32>
    %147 = arith.addf %144, %146 : vector<1x128xf32>
    %148 = vector.broadcast %18 : f32 to vector<1x128xf32>
    %149 = arith.addf %147, %148 : vector<1x128xf32>
    %cst_11 = arith.constant 0.000000e+00 : f32
    %150 = vector.broadcast %cst_11 : f32 to vector<1x128xf32>
    %151 = arith.maximumf %149, %150 : vector<1x128xf32>
    %152 = vector.broadcast %12 : f32 to vector<1x128xf32>
    %153 = arith.mulf %152, %99 : vector<1x128xf32>
    %154 = vector.broadcast %13 : f32 to vector<1x128xf32>
    %155 = arith.mulf %154, %101 : vector<1x128xf32>
    %156 = arith.addf %153, %155 : vector<1x128xf32>
    %157 = vector.broadcast %14 : f32 to vector<1x128xf32>
    %158 = arith.mulf %157, %103 : vector<1x128xf32>
    %159 = arith.addf %156, %158 : vector<1x128xf32>
    %160 = vector.broadcast %19 : f32 to vector<1x128xf32>
    %161 = arith.addf %159, %160 : vector<1x128xf32>
    %cst_12 = arith.constant 0.000000e+00 : f32
    %162 = vector.broadcast %cst_12 : f32 to vector<1x128xf32>
    %163 = arith.maximumf %161, %162 : vector<1x128xf32>
    %164 = vector.broadcast %20 : f32 to vector<1x128xf32>
    %165 = arith.mulf %164, %115 : vector<1x128xf32>
    %166 = vector.broadcast %21 : f32 to vector<1x128xf32>
    %167 = arith.mulf %166, %127 : vector<1x128xf32>
    %168 = arith.addf %165, %167 : vector<1x128xf32>
    %169 = vector.broadcast %22 : f32 to vector<1x128xf32>
    %170 = arith.mulf %169, %139 : vector<1x128xf32>
    %171 = arith.addf %168, %170 : vector<1x128xf32>
    %172 = vector.broadcast %23 : f32 to vector<1x128xf32>
    %173 = arith.mulf %172, %151 : vector<1x128xf32>
    %174 = arith.addf %171, %173 : vector<1x128xf32>
    %175 = vector.broadcast %24 : f32 to vector<1x128xf32>
    %176 = arith.mulf %175, %163 : vector<1x128xf32>
    %177 = arith.addf %174, %176 : vector<1x128xf32>
    %178 = vector.broadcast %45 : f32 to vector<1x128xf32>
    %179 = arith.addf %177, %178 : vector<1x128xf32>
    %cst_13 = arith.constant 0.000000e+00 : f32
    %180 = vector.broadcast %cst_13 : f32 to vector<1x128xf32>
    %181 = arith.maximumf %179, %180 : vector<1x128xf32>
    %182 = vector.broadcast %25 : f32 to vector<1x128xf32>
    %183 = arith.mulf %182, %115 : vector<1x128xf32>
    %184 = vector.broadcast %26 : f32 to vector<1x128xf32>
    %185 = arith.mulf %184, %127 : vector<1x128xf32>
    %186 = arith.addf %183, %185 : vector<1x128xf32>
    %187 = vector.broadcast %27 : f32 to vector<1x128xf32>
    %188 = arith.mulf %187, %139 : vector<1x128xf32>
    %189 = arith.addf %186, %188 : vector<1x128xf32>
    %190 = vector.broadcast %28 : f32 to vector<1x128xf32>
    %191 = arith.mulf %190, %151 : vector<1x128xf32>
    %192 = arith.addf %189, %191 : vector<1x128xf32>
    %193 = vector.broadcast %29 : f32 to vector<1x128xf32>
    %194 = arith.mulf %193, %163 : vector<1x128xf32>
    %195 = arith.addf %192, %194 : vector<1x128xf32>
    %196 = vector.broadcast %46 : f32 to vector<1x128xf32>
    %197 = arith.addf %195, %196 : vector<1x128xf32>
    %cst_14 = arith.constant 0.000000e+00 : f32
    %198 = vector.broadcast %cst_14 : f32 to vector<1x128xf32>
    %199 = arith.maximumf %197, %198 : vector<1x128xf32>
    %200 = vector.broadcast %30 : f32 to vector<1x128xf32>
    %201 = arith.mulf %200, %115 : vector<1x128xf32>
    %202 = vector.broadcast %31 : f32 to vector<1x128xf32>
    %203 = arith.mulf %202, %127 : vector<1x128xf32>
    %204 = arith.addf %201, %203 : vector<1x128xf32>
    %205 = vector.broadcast %32 : f32 to vector<1x128xf32>
    %206 = arith.mulf %205, %139 : vector<1x128xf32>
    %207 = arith.addf %204, %206 : vector<1x128xf32>
    %208 = vector.broadcast %33 : f32 to vector<1x128xf32>
    %209 = arith.mulf %208, %151 : vector<1x128xf32>
    %210 = arith.addf %207, %209 : vector<1x128xf32>
    %211 = vector.broadcast %34 : f32 to vector<1x128xf32>
    %212 = arith.mulf %211, %163 : vector<1x128xf32>
    %213 = arith.addf %210, %212 : vector<1x128xf32>
    %214 = vector.broadcast %47 : f32 to vector<1x128xf32>
    %215 = arith.addf %213, %214 : vector<1x128xf32>
    %cst_15 = arith.constant 0.000000e+00 : f32
    %216 = vector.broadcast %cst_15 : f32 to vector<1x128xf32>
    %217 = arith.maximumf %215, %216 : vector<1x128xf32>
    %218 = vector.broadcast %35 : f32 to vector<1x128xf32>
    %219 = arith.mulf %218, %115 : vector<1x128xf32>
    %220 = vector.broadcast %36 : f32 to vector<1x128xf32>
    %221 = arith.mulf %220, %127 : vector<1x128xf32>
    %222 = arith.addf %219, %221 : vector<1x128xf32>
    %223 = vector.broadcast %37 : f32 to vector<1x128xf32>
    %224 = arith.mulf %223, %139 : vector<1x128xf32>
    %225 = arith.addf %222, %224 : vector<1x128xf32>
    %226 = vector.broadcast %38 : f32 to vector<1x128xf32>
    %227 = arith.mulf %226, %151 : vector<1x128xf32>
    %228 = arith.addf %225, %227 : vector<1x128xf32>
    %229 = vector.broadcast %39 : f32 to vector<1x128xf32>
    %230 = arith.mulf %229, %163 : vector<1x128xf32>
    %231 = arith.addf %228, %230 : vector<1x128xf32>
    %232 = vector.broadcast %48 : f32 to vector<1x128xf32>
    %233 = arith.addf %231, %232 : vector<1x128xf32>
    %cst_16 = arith.constant 0.000000e+00 : f32
    %234 = vector.broadcast %cst_16 : f32 to vector<1x128xf32>
    %235 = arith.maximumf %233, %234 : vector<1x128xf32>
    %236 = vector.broadcast %40 : f32 to vector<1x128xf32>
    %237 = arith.mulf %236, %115 : vector<1x128xf32>
    %238 = vector.broadcast %41 : f32 to vector<1x128xf32>
    %239 = arith.mulf %238, %127 : vector<1x128xf32>
    %240 = arith.addf %237, %239 : vector<1x128xf32>
    %241 = vector.broadcast %42 : f32 to vector<1x128xf32>
    %242 = arith.mulf %241, %139 : vector<1x128xf32>
    %243 = arith.addf %240, %242 : vector<1x128xf32>
    %244 = vector.broadcast %43 : f32 to vector<1x128xf32>
    %245 = arith.mulf %244, %151 : vector<1x128xf32>
    %246 = arith.addf %243, %245 : vector<1x128xf32>
    %247 = vector.broadcast %44 : f32 to vector<1x128xf32>
    %248 = arith.mulf %247, %163 : vector<1x128xf32>
    %249 = arith.addf %246, %248 : vector<1x128xf32>
    %250 = vector.broadcast %49 : f32 to vector<1x128xf32>
    %251 = arith.addf %249, %250 : vector<1x128xf32>
    %cst_17 = arith.constant 0.000000e+00 : f32
    %252 = vector.broadcast %cst_17 : f32 to vector<1x128xf32>
    %253 = arith.maximumf %251, %252 : vector<1x128xf32>
    %254 = vector.broadcast %50 : f32 to vector<1x128xf32>
    %255 = arith.mulf %254, %181 : vector<1x128xf32>
    %256 = vector.broadcast %51 : f32 to vector<1x128xf32>
    %257 = arith.mulf %256, %199 : vector<1x128xf32>
    %258 = arith.addf %255, %257 : vector<1x128xf32>
    %259 = vector.broadcast %52 : f32 to vector<1x128xf32>
    %260 = arith.mulf %259, %217 : vector<1x128xf32>
    %261 = arith.addf %258, %260 : vector<1x128xf32>
    %262 = vector.broadcast %53 : f32 to vector<1x128xf32>
    %263 = arith.mulf %262, %235 : vector<1x128xf32>
    %264 = arith.addf %261, %263 : vector<1x128xf32>
    %265 = vector.broadcast %54 : f32 to vector<1x128xf32>
    %266 = arith.mulf %265, %253 : vector<1x128xf32>
    %267 = arith.addf %264, %266 : vector<1x128xf32>
    %268 = vector.broadcast %75 : f32 to vector<1x128xf32>
    %269 = arith.addf %267, %268 : vector<1x128xf32>
    %cst_18 = arith.constant 0.000000e+00 : f32
    %270 = vector.broadcast %cst_18 : f32 to vector<1x128xf32>
    %271 = arith.maximumf %269, %270 : vector<1x128xf32>
    %272 = vector.broadcast %55 : f32 to vector<1x128xf32>
    %273 = arith.mulf %272, %181 : vector<1x128xf32>
    %274 = vector.broadcast %56 : f32 to vector<1x128xf32>
    %275 = arith.mulf %274, %199 : vector<1x128xf32>
    %276 = arith.addf %273, %275 : vector<1x128xf32>
    %277 = vector.broadcast %57 : f32 to vector<1x128xf32>
    %278 = arith.mulf %277, %217 : vector<1x128xf32>
    %279 = arith.addf %276, %278 : vector<1x128xf32>
    %280 = vector.broadcast %58 : f32 to vector<1x128xf32>
    %281 = arith.mulf %280, %235 : vector<1x128xf32>
    %282 = arith.addf %279, %281 : vector<1x128xf32>
    %283 = vector.broadcast %59 : f32 to vector<1x128xf32>
    %284 = arith.mulf %283, %253 : vector<1x128xf32>
    %285 = arith.addf %282, %284 : vector<1x128xf32>
    %286 = vector.broadcast %76 : f32 to vector<1x128xf32>
    %287 = arith.addf %285, %286 : vector<1x128xf32>
    %cst_19 = arith.constant 0.000000e+00 : f32
    %288 = vector.broadcast %cst_19 : f32 to vector<1x128xf32>
    %289 = arith.maximumf %287, %288 : vector<1x128xf32>
    %290 = vector.broadcast %60 : f32 to vector<1x128xf32>
    %291 = arith.mulf %290, %181 : vector<1x128xf32>
    %292 = vector.broadcast %61 : f32 to vector<1x128xf32>
    %293 = arith.mulf %292, %199 : vector<1x128xf32>
    %294 = arith.addf %291, %293 : vector<1x128xf32>
    %295 = vector.broadcast %62 : f32 to vector<1x128xf32>
    %296 = arith.mulf %295, %217 : vector<1x128xf32>
    %297 = arith.addf %294, %296 : vector<1x128xf32>
    %298 = vector.broadcast %63 : f32 to vector<1x128xf32>
    %299 = arith.mulf %298, %235 : vector<1x128xf32>
    %300 = arith.addf %297, %299 : vector<1x128xf32>
    %301 = vector.broadcast %64 : f32 to vector<1x128xf32>
    %302 = arith.mulf %301, %253 : vector<1x128xf32>
    %303 = arith.addf %300, %302 : vector<1x128xf32>
    %304 = vector.broadcast %77 : f32 to vector<1x128xf32>
    %305 = arith.addf %303, %304 : vector<1x128xf32>
    %cst_20 = arith.constant 0.000000e+00 : f32
    %306 = vector.broadcast %cst_20 : f32 to vector<1x128xf32>
    %307 = arith.maximumf %305, %306 : vector<1x128xf32>
    %308 = vector.broadcast %65 : f32 to vector<1x128xf32>
    %309 = arith.mulf %308, %181 : vector<1x128xf32>
    %310 = vector.broadcast %66 : f32 to vector<1x128xf32>
    %311 = arith.mulf %310, %199 : vector<1x128xf32>
    %312 = arith.addf %309, %311 : vector<1x128xf32>
    %313 = vector.broadcast %67 : f32 to vector<1x128xf32>
    %314 = arith.mulf %313, %217 : vector<1x128xf32>
    %315 = arith.addf %312, %314 : vector<1x128xf32>
    %316 = vector.broadcast %68 : f32 to vector<1x128xf32>
    %317 = arith.mulf %316, %235 : vector<1x128xf32>
    %318 = arith.addf %315, %317 : vector<1x128xf32>
    %319 = vector.broadcast %69 : f32 to vector<1x128xf32>
    %320 = arith.mulf %319, %253 : vector<1x128xf32>
    %321 = arith.addf %318, %320 : vector<1x128xf32>
    %322 = vector.broadcast %78 : f32 to vector<1x128xf32>
    %323 = arith.addf %321, %322 : vector<1x128xf32>
    %cst_21 = arith.constant 0.000000e+00 : f32
    %324 = vector.broadcast %cst_21 : f32 to vector<1x128xf32>
    %325 = arith.maximumf %323, %324 : vector<1x128xf32>
    %326 = vector.broadcast %70 : f32 to vector<1x128xf32>
    %327 = arith.mulf %326, %181 : vector<1x128xf32>
    %328 = vector.broadcast %71 : f32 to vector<1x128xf32>
    %329 = arith.mulf %328, %199 : vector<1x128xf32>
    %330 = arith.addf %327, %329 : vector<1x128xf32>
    %331 = vector.broadcast %72 : f32 to vector<1x128xf32>
    %332 = arith.mulf %331, %217 : vector<1x128xf32>
    %333 = arith.addf %330, %332 : vector<1x128xf32>
    %334 = vector.broadcast %73 : f32 to vector<1x128xf32>
    %335 = arith.mulf %334, %235 : vector<1x128xf32>
    %336 = arith.addf %333, %335 : vector<1x128xf32>
    %337 = vector.broadcast %74 : f32 to vector<1x128xf32>
    %338 = arith.mulf %337, %253 : vector<1x128xf32>
    %339 = arith.addf %336, %338 : vector<1x128xf32>
    %340 = vector.broadcast %79 : f32 to vector<1x128xf32>
    %341 = arith.addf %339, %340 : vector<1x128xf32>
    %cst_22 = arith.constant 0.000000e+00 : f32
    %342 = vector.broadcast %cst_22 : f32 to vector<1x128xf32>
    %343 = arith.maximumf %341, %342 : vector<1x128xf32>
    %344 = vector.broadcast %80 : f32 to vector<1x128xf32>
    %345 = arith.mulf %344, %271 : vector<1x128xf32>
    %346 = vector.broadcast %81 : f32 to vector<1x128xf32>
    %347 = arith.mulf %346, %289 : vector<1x128xf32>
    %348 = arith.addf %345, %347 : vector<1x128xf32>
    %349 = vector.broadcast %82 : f32 to vector<1x128xf32>
    %350 = arith.mulf %349, %307 : vector<1x128xf32>
    %351 = arith.addf %348, %350 : vector<1x128xf32>
    %352 = vector.broadcast %83 : f32 to vector<1x128xf32>
    %353 = arith.mulf %352, %325 : vector<1x128xf32>
    %354 = arith.addf %351, %353 : vector<1x128xf32>
    %355 = vector.broadcast %84 : f32 to vector<1x128xf32>
    %356 = arith.mulf %355, %343 : vector<1x128xf32>
    %357 = arith.addf %354, %356 : vector<1x128xf32>
    %358 = vector.broadcast %95 : f32 to vector<1x128xf32>
    %359 = arith.addf %357, %358 : vector<1x128xf32>
    %360 = vector.broadcast %85 : f32 to vector<1x128xf32>
    %361 = arith.mulf %360, %271 : vector<1x128xf32>
    %362 = vector.broadcast %86 : f32 to vector<1x128xf32>
    %363 = arith.mulf %362, %289 : vector<1x128xf32>
    %364 = arith.addf %361, %363 : vector<1x128xf32>
    %365 = vector.broadcast %87 : f32 to vector<1x128xf32>
    %366 = arith.mulf %365, %307 : vector<1x128xf32>
    %367 = arith.addf %364, %366 : vector<1x128xf32>
    %368 = vector.broadcast %88 : f32 to vector<1x128xf32>
    %369 = arith.mulf %368, %325 : vector<1x128xf32>
    %370 = arith.addf %367, %369 : vector<1x128xf32>
    %371 = vector.broadcast %89 : f32 to vector<1x128xf32>
    %372 = arith.mulf %371, %343 : vector<1x128xf32>
    %373 = arith.addf %370, %372 : vector<1x128xf32>
    %374 = vector.broadcast %96 : f32 to vector<1x128xf32>
    %375 = arith.addf %373, %374 : vector<1x128xf32>
    %376 = vector.broadcast %90 : f32 to vector<1x128xf32>
    %377 = arith.mulf %376, %271 : vector<1x128xf32>
    %378 = vector.broadcast %91 : f32 to vector<1x128xf32>
    %379 = arith.mulf %378, %289 : vector<1x128xf32>
    %380 = arith.addf %377, %379 : vector<1x128xf32>
    %381 = vector.broadcast %92 : f32 to vector<1x128xf32>
    %382 = arith.mulf %381, %307 : vector<1x128xf32>
    %383 = arith.addf %380, %382 : vector<1x128xf32>
    %384 = vector.broadcast %93 : f32 to vector<1x128xf32>
    %385 = arith.mulf %384, %325 : vector<1x128xf32>
    %386 = arith.addf %383, %385 : vector<1x128xf32>
    %387 = vector.broadcast %94 : f32 to vector<1x128xf32>
    %388 = arith.mulf %387, %343 : vector<1x128xf32>
    %389 = arith.addf %386, %388 : vector<1x128xf32>
    %390 = vector.broadcast %97 : f32 to vector<1x128xf32>
    %391 = arith.addf %389, %390 : vector<1x128xf32>
    %c0_23 = arith.constant 0 : index
    %c0_24 = arith.constant 0 : index
    %c0_25 = arith.constant 0 : index
    %392 = vector.load %arg3[%c0_23, %c0_24, %c0_25] : memref<3x1x128xf32, #tpu.memory_space<vmem>>, vector<1x1x128xf32>
    %393 = vector.shape_cast %392 : vector<1x1x128xf32> to vector<1x128xf32>
    %394 = vector.shape_cast %359 : vector<1x128xf32> to vector<1x1x128xf32>
    tpu.vector_store %arg3[%c0_23, %c0_24, %c0_25], %394 {strides = array<i32>} : memref<3x1x128xf32, #tpu.memory_space<vmem>>, vector<1x1x128xf32>,
    %c1_26 = arith.constant 1 : index
    %c0_27 = arith.constant 0 : index
    %c0_28 = arith.constant 0 : index
    %395 = vector.load %arg3[%c1_26, %c0_27, %c0_28] : memref<3x1x128xf32, #tpu.memory_space<vmem>>, vector<1x1x128xf32>
    %396 = vector.shape_cast %395 : vector<1x1x128xf32> to vector<1x128xf32>
    %397 = vector.shape_cast %375 : vector<1x128xf32> to vector<1x1x128xf32>
    tpu.vector_store %arg3[%c1_26, %c0_27, %c0_28], %397 {strides = array<i32>} : memref<3x1x128xf32, #tpu.memory_space<vmem>>, vector<1x1x128xf32>,
    %c2_29 = arith.constant 2 : index
    %c0_30 = arith.constant 0 : index
    %c0_31 = arith.constant 0 : index
    %398 = vector.load %arg3[%c2_29, %c0_30, %c0_31] : memref<3x1x128xf32, #tpu.memory_space<vmem>>, vector<1x1x128xf32>
    %399 = vector.shape_cast %398 : vector<1x1x128xf32> to vector<1x128xf32>
    %400 = vector.shape_cast %391 : vector<1x128xf32> to vector<1x1x128xf32>
    tpu.vector_store %arg3[%c2_29, %c0_30, %c0_31], %400 {strides = array<i32>} : memref<3x1x128xf32, #tpu.memory_space<vmem>>, vector<1x1x128xf32>,
    return
  }
  func.func @transform_0(%arg0: i32) -> i32 {
    %c0_i32 = arith.constant 0 : i32
    %c0_i32_0 = arith.constant 0 : i32
    return %c0_i32 : i32
  }
  func.func @transform_1(%arg0: i32) -> (i32, i32, i32) {
    %c0_i32 = arith.constant 0 : i32
    %c0_i32_0 = arith.constant 0 : i32
    %c0_i32_1 = arith.constant 0 : i32
    return %c0_i32, %arg0, %c0_i32_0 : i32, i32, i32
  }
  func.func @transform_2(%arg0: i32) -> (i32, i32, i32) {
    %c0_i32 = arith.constant 0 : i32
    %c0_i32_0 = arith.constant 0 : i32
    %c0_i32_1 = arith.constant 0 : i32
    return %c0_i32, %arg0, %c0_i32_0 : i32, i32, i32
  }
}

</mosaic_0001>

<bundles_post_ra>
// kernel: tpu_custom_call.1
= control target key start
LH: loop header
LB: loop body
LE: loop exit
PB: predicated region body
PF: predicated region fallthrough
CT: control target
= control target key end

     0   :  { %7 = vsyncpa [#allocation4], 0  ;;  %s981_s0 = inlined_call_operand.hbm [shape: f32[98], index: 0, kind: input, shape index: {}]   ;;  %s982_s1 = inlined_call_operand.vmem [shape: f32[3,1,128], index: 1, kind: input, shape index: {}]   ;;  %s983_s2 = inlined_call_operand.hbm [shape: f32[3,1,128], index: 2, kind: output, shape index: {}]  }
   0x1   :  { %8 = vsyncpa [#allocation3], 0  ;;  %s524_s11 = scalar_lea.hbm %s981_s0, 16 }
   0x2   :  { %p525_p0 = scmp.ne.s32.totalorder %s981_s0, %s524_s11  ;;  %p528_p1 = scmp.lt.u32.totalorder %s524_s11, %s981_s0 }
   0x4   :  { %p530_p2 = pnand %p528_p1, %p525_p0 }
   0x6   :  { %533 = shalt.err (!%p530_p2)
}
   0x7   :  { %s560_s16 = smov [#allocation2]  }
   0x8   :  { %16 = dma.hbm_to_smem %s981_s0, 16, %s560_s16, [#allocation4]  }
   0x9   :  { %556 = dma.done.wait [#allocation4], 16  }
   0xa   :  { %557 = vsyncadd [#allocation4], 4294967280 }
   0xb   :  { %22 = sfence }
   0xc   :  { %s23_s19 = sld [smem:[#allocation2]]  ;;  %s421_s20 = sld [smem:[#allocation2 + $0x1]]  ;;  %v598_v0 = vld [vmem:[%s982_s1] sm:$0x1]  ;;  %v607_v1 = vld [vmem:[%s982_s1 + $0x1] sm:$0x1] }
   0xd   :  { %s422_s21 = sld [smem:[#allocation2 + $0x2]]  ;;  %s423_s22 = sld [smem:[#allocation2 + $0x3]]  ;;  %v616_v2 = vld [vmem:[%s982_s1 + $0x2] sm:$0x1] }
   0xe   :  { %s424_s23 = sld [smem:[#allocation2 + $0x4]]  ;;  %s425_s24 = sld [smem:[#allocation2 + $0x5]] }
   0xf   :  { %s591_s25 = sld [smem:[#allocation2 + $0x6]]  ;;  %s593_s26 = sld [smem:[#allocation2 + $0x7]] }
  0x10   :  { %s600_s29 = sld [smem:[#allocation2 + $0x8]]  ;;  %s602_s0 = sld [smem:[#allocation2 + $0x9]] }
  0x11   :  { %s609_s4 = sld [smem:[#allocation2 + $0xa]]  ;;  %s611_s5 = sld [smem:[#allocation2 + $0xb]] }
  0x12   :  { %s618_s8 = sld [smem:[#allocation2 + $0xc]]  ;;  %s620_s9 = sld [smem:[#allocation2 + $0xd]]  ;;  %v126_v3 = vstv %s23_s19  ;;  %v128_v4 = vstv %s421_s20 }
  0x13   :  { %s622_s10 = sld [smem:[#allocation2 + $0xe]]  ;;  %s624_s11 = sld [smem:[#allocation2 + $0xf]]  ;;  %v127_v5 = vmul.f32 %v126_v3, %v598_v0  ;;  %v129_v6 = vmul.f32 %v607_v1, %v128_v4  ;;  %v131_v7 = vstv %s422_s21  ;;  %v137_v8 = vstv %s423_s22 }
  0x14   :  { %s628_s1 = sld [smem:[#allocation2 + $0x10]]  ;;  %s630_s12 = sld [smem:[#allocation2 + $0x11]]  ;;  %v132_v9 = vmul.f32 %v616_v2, %v131_v7  ;;  %v138_v10 = vmul.f32 %v137_v8, %v598_v0  ;;  %v139_v11 = vstv %s424_s23  ;;  %v142_v12 = vstv %s425_s24 }
  0x15   :  { %s634_s13 = sld [smem:[#allocation2 + $0x12]]  ;;  %s636_s14 = sld [smem:[#allocation2 + $0x13]]  ;;  %v130_v13 = vadd.f32 %v129_v6, %v127_v5  ;;  %v140_v14 = vmul.f32 %v607_v1, %v139_v11  ;;  %v143_v15 = vmul.f32 %v616_v2, %v142_v12  ;;  %v148_v16 = vstv %s591_s25 }
  0x16   :  { %s641_s15 = sld [smem:[#allocation2 + $0x14]]  ;;  %s643_s16 = sld [smem:[#allocation2 + $0x15]]  ;;  %v149_v17 = vmul.f32 %v148_v16, %v598_v0  ;;  %v150_v18 = vstv %s593_s26  ;;  %v153_v19 = vstv %s600_s29  ;;  %v159_v20 = vstv %s602_s0 }
  0x17   :  { %s649_s17 = sld [smem:[#allocation2 + $0x16]]  ;;  %v133_v21 = vadd.f32 %v132_v9, %v130_v13  ;;  %v141_v22 = vadd.f32 %v140_v14, %v138_v10  ;;  %v151_v23 = vmul.f32 %v607_v1, %v150_v18  ;;  %v154_v24 = vmul.f32 %v616_v2, %v153_v19  ;;  %s653_s18 = sld [smem:[#allocation2 + $0x17]] }
  0x18   :  { %s655_s19 = sld [smem:[#allocation2 + $0x18]]  ;;  %v160_v25 = vmul.f32 %v159_v20, %v598_v0  ;;  %v161_v26 = vstv %s609_s4  ;;  %v164_v27 = vstv %s611_s5  ;;  %v170_v28 = vstv %s618_s8  ;;  %s661_s20 = sld [smem:[#allocation2 + $0x19]] }
  0x19   :  { %v134_v29 = vstv %s624_s11  ;;  %v144_v30 = vadd.f32 %v143_v15, %v141_v22  ;;  %v152_v31 = vadd.f32 %v151_v23, %v149_v17  ;;  %v162_v32 = vmul.f32 %v607_v1, %v161_v26  ;;  %s665_s21 = sld [smem:[#allocation2 + $0x1a]]  ;;  %s667_s22 = sld [smem:[#allocation2 + $0x1b]] }
  0x1a   :  { %v135_v33 = vadd.f32 %v134_v29, %v133_v21  ;;  %v145_v34 = vstv %s628_s1  ;;  %v156_v35 = vstv %s630_s12  ;;  %v165_v36 = vmul.f32 %v616_v2, %v164_v27  ;;  %s672_s23 = sld [smem:[#allocation2 + $0x1c]]  ;;  %s675_s24 = sld [smem:[#allocation2 + $0x1d]] }
  0x1b   :  { %v146_v37 = vadd.f32 %v145_v34, %v144_v30  ;;  %v155_v38 = vadd.f32 %v154_v24, %v152_v31  ;;  %v163_v39 = vadd.f32 %v162_v32, %v160_v25  ;;  %v167_v40 = vstv %s634_s13  ;;  %s677_s25 = sld [smem:[#allocation2 + $0x1e]]  ;;  %s684_s26 = sld [smem:[#allocation2 + $0x1f]] }
  0x1c   :  { %v679_v41 = vmax.f32 %v135_v33, 0.0  ;;  %v171_v42 = vmul.f32 %v170_v28, %v598_v0  ;;  %v172_v43 = vstv %s620_s9  ;;  %v175_v44 = vstv %s622_s10  ;;  %s689_s27 = sld [smem:[#allocation2 + $0x20]]  ;;  %s691_s28 = sld [smem:[#allocation2 + $0x21]] }
  0x1d   :  { %v686_v45 = vmax.f32 %v146_v37, 0.0  ;;  %v157_v46 = vadd.f32 %v156_v35, %v155_v38  ;;  %v166_v47 = vadd.f32 %v165_v36, %v163_v39  ;;  %v173_v48 = vmul.f32 %v607_v1, %v172_v43  ;;  %s700_s29 = sld [smem:[#allocation2 + $0x22]]  ;;  %s706_s0 = sld [smem:[#allocation2 + $0x23]] }
  0x1e   :  { %v176_v49 = vmul.f32 %v616_v2, %v175_v44  ;;  %v178_v50 = vstv %s636_s14  ;;  %v181_v51 = vstv %s641_s15  ;;  %v183_v52 = vstv %s643_s16  ;;  %s712_s30 = sld [smem:[#allocation2 + $0x24]]  ;;  %s714_s3 = sld [smem:[#allocation2 + $0x2d]] }
  0x1f   :  { %v697_v53 = vmax.f32 %v157_v46, 0.0  ;;  %v168_v54 = vadd.f32 %v167_v40, %v166_v47  ;;  %v174_v55 = vadd.f32 %v173_v48, %v171_v42  ;;  %v182_v56 = vmul.f32 %v181_v51, %v679_v41  ;;  %s719_s4 = sld [smem:[#allocation2 + $0x25]]  ;;  %s721_s5 = sld [smem:[#allocation2 + $0x2e]] }
  0x20   :  { %v184_v57 = vmul.f32 %v183_v52, %v686_v45  ;;  %v186_v58 = vstv %s649_s17  ;;  %v189_v59 = vstv %s653_s18  ;;  %v192_v60 = vstv %s655_s19  ;;  %s726_s6 = sld [smem:[#allocation2 + $0x26]]  ;;  %s728_s7 = sld [smem:[#allocation2 + $0x27]] }
  0x21   :  { %v708_v61 = vmax.f32 %v168_v54, 0.0  ;;  %v177_v62 = vadd.f32 %v176_v49, %v174_v55  ;;  %v187_v63 = vmul.f32 %v186_v58, %v697_v53  ;;  %v198_v0 = vstv %s661_s20  ;;  %s733_s8 = sld [smem:[#allocation2 + $0x2f]]  ;;  %s742_s9 = sld [smem:[#allocation2 + $0x28]] }
  0x22   :  { %v185_v1 = vadd.f32 %v184_v57, %v182_v56  ;;  %v199_v2 = vmul.f32 %v198_v0, %v679_v41  ;;  %v200_v3 = vstv %s665_s21  ;;  %v203_v4 = vstv %s667_s22  ;;  %s744_s10 = sld [smem:[#allocation2 + $0x29]]  ;;  %s749_s11 = sld [smem:[#allocation2 + $0x2a]] }
  0x23   :  { %v179_v5 = vadd.f32 %v178_v50, %v177_v62  ;;  %v190_v6 = vmul.f32 %v189_v59, %v708_v61  ;;  %v201_v7 = vmul.f32 %v200_v3, %v686_v45  ;;  %v204_v8 = vmul.f32 %v203_v4, %v697_v53  ;;  %s754_s1 = sld [smem:[#allocation2 + $0x2b]]  ;;  %s756_s12 = sld [smem:[#allocation2 + $0x2c]] }
  0x24   :  { %v188_v9 = vadd.f32 %v187_v63, %v185_v1  ;;  %v206_v10 = vstv %s672_s23  ;;  %v209_v11 = vstv %s675_s24  ;;  %v215_v12 = vstv %s677_s25  ;;  %s759_s13 = sld [smem:[#allocation2 + $0x30]]  ;;  %s765_s14 = sld [smem:[#allocation2 + $0x32]] }
  0x25   :  { %v735_v13 = vmax.f32 %v179_v5, 0.0  ;;  %v202_v14 = vadd.f32 %v201_v7, %v199_v2  ;;  %v207_v15 = vmul.f32 %v206_v10, %v708_v61  ;;  %v216_v16 = vmul.f32 %v215_v12, %v679_v41  ;;  %s767_s15 = sld [smem:[#allocation2 + $0x33]]  ;;  %s770_s16 = sld [smem:[#allocation2 + $0x31]] }
  0x26   :  { %v191_v17 = vadd.f32 %v190_v6, %v188_v9  ;;  %v217_v18 = vstv %s684_s26  ;;  %v220_v19 = vstv %s689_s27  ;;  %v223_v20 = vstv %s691_s28  ;;  %s772_s17 = sld [smem:[#allocation2 + $0x34]]  ;;  %s778_s18 = sld [smem:[#allocation2 + $0x35]] }
  0x27   :  { %v193_v21 = vmul.f32 %v192_v60, %v735_v13  ;;  %v205_v22 = vadd.f32 %v204_v8, %v202_v14  ;;  %v210_v23 = vmul.f32 %v209_v11, %v735_v13  ;;  %v218_v24 = vmul.f32 %v217_v18, %v686_v45  ;;  %s780_s19 = sld [smem:[#allocation2 + $0x37]]  ;;  %s784_s20 = sld [smem:[#allocation2 + $0x36]] }
  0x28   :  { %v195_v25 = vstv %s714_s3  ;;  %v221_v26 = vmul.f32 %v220_v19, %v697_v53  ;;  %v226_v27 = vstv %s700_s29  ;;  %v224_v31 = vmul.f32 %v223_v20, %v708_v61  ;;  %s790_s21 = sld [smem:[#allocation2 + $0x38]]  ;;  %s792_s22 = sld [smem:[#allocation2 + $0x39]] }
  0x29   :  { %v194_v28 = vadd.f32 %v193_v21, %v191_v17  ;;  %v208_v29 = vadd.f32 %v207_v15, %v205_v22  ;;  %v219_v30 = vadd.f32 %v218_v24, %v216_v16  ;;  %v212_v32 = vstv %s721_s5  ;;  %s798_s23 = sld [smem:[#allocation2 + $0x3a]]  ;;  %s803_s24 = sld [smem:[#allocation2 + $0x3b]] }
  0x2a   :  { %v227_v33 = vmul.f32 %v226_v27, %v735_v13  ;;  %v232_v34 = vstv %s706_s0  ;;  %v234_v35 = vstv %s712_s30  ;;  %v237_v42 = vstv %s719_s4  ;;  %s805_s25 = sld [smem:[#allocation2 + $0x4b]]  ;;  %s810_s26 = sld [smem:[#allocation2 + $0x3c]] }
  0x2b   :  { %v196_v36 = vadd.f32 %v195_v25, %v194_v28  ;;  %v211_v37 = vadd.f32 %v210_v23, %v208_v29  ;;  %v222_v38 = vadd.f32 %v221_v26, %v219_v30  ;;  %v233_v39 = vmul.f32 %v232_v34, %v679_v41  ;;  %s812_s27 = sld [smem:[#allocation2 + $0x3d]]  ;;  %s816_s28 = sld [smem:[#allocation2 + $0x3e]] }
  0x2c   :  { %v235_v40 = vmul.f32 %v234_v35, %v686_v45  ;;  %v240_v43 = vstv %s726_s6  ;;  %v243_v44 = vstv %s728_s7  ;;  %v229_v48 = vstv %s733_s8  ;;  %s818_s29 = sld [smem:[#allocation2 + $0x3f]]  ;;  %s827_s0 = sld [smem:[#allocation2 + $0x40]] }
  0x2d   :  { %v213_v46 = vadd.f32 %v212_v32, %v211_v37  ;;  %v225_v47 = vadd.f32 %v224_v31, %v222_v38  ;;  %v238_v49 = vmul.f32 %v237_v42, %v697_v53  ;;  %v786_v50 = vmax.f32 %v196_v36, 0.0  ;;  %s829_s30 = sld [smem:[#allocation2 + $0x4c]]  ;;  %s836_s3 = sld [smem:[#allocation2 + $0x41]] }
  0x2e   :  { %v236_v51 = vadd.f32 %v235_v40, %v233_v39  ;;  %v241_v52 = vmul.f32 %v240_v43, %v708_v61  ;;  %v244_v54 = vmul.f32 %v243_v44, %v735_v13  ;;  %v249_v57 = vstv %s742_s9  ;;  %s838_s4 = sld [smem:[#allocation2 + $0x42]]  ;;  %s844_s5 = sld [smem:[#allocation2 + $0x43]] }
  0x2f   :  { %v794_v55 = vmax.f32 %v213_v46, 0.0  ;;  %v228_v56 = vadd.f32 %v227_v33, %v225_v47  ;;  %v251_v58 = vstv %s744_s10  ;;  %v250_v60 = vmul.f32 %v249_v57, %v679_v41  ;;  %s849_s6 = sld [smem:[#allocation2 + $0x44]]  ;;  %s851_s7 = sld [smem:[#allocation2 + $0x45]] }
  0x30   :  { %v239_v59 = vadd.f32 %v238_v49, %v236_v51  ;;  %v252_v62 = vmul.f32 %v251_v58, %v686_v45  ;;  %v254_v63 = vstv %s749_s11  ;;  %v257_v2 = vstv %s754_s1  ;;  %s859_s8 = sld [smem:[#allocation2 + $0x4d]]  ;;  %s865_s9 = sld [smem:[#allocation2 + $0x46]] }
  0x31   :  { %v230_v0 = vadd.f32 %v229_v48, %v228_v56  ;;  %v255_v1 = vmul.f32 %v254_v63, %v697_v53  ;;  %v260_v3 = vstv %s756_s12  ;;  %v246_v41 = vstv %s759_s13  ;;  %s870_s10 = sld [smem:[#allocation2 + $0x47]]  ;;  %s872_s11 = sld [smem:[#allocation2 + $0x48]] }
  0x32   :  { %v242_v4 = vadd.f32 %v241_v52, %v239_v59  ;;  %v253_v45 = vadd.f32 %v252_v62, %v250_v60  ;;  %v258_v5 = vmul.f32 %v257_v2, %v708_v61  ;;  %v261_v6 = vmul.f32 %v260_v3, %v735_v13  ;;  %s878_s1 = sld [smem:[#allocation2 + $0x49]]  ;;  %s883_s12 = sld [smem:[#allocation2 + $0x4a]] }
  0x33   :  { %v820_v53 = vmax.f32 %v230_v0, 0.0  ;;  %v266_v7 = vstv %s765_s14  ;;  %v268_v8 = vstv %s767_s15  ;;  %v263_v61 = vstv %s770_s16  ;;  %s885_s13 = sld [smem:[#allocation2 + $0x4e]]  ;;  %s890_s14 = sld [smem:[#allocation2 + $0x50]] }
  0x34   :  { %v245_v9 = vadd.f32 %v244_v54, %v242_v4  ;;  %v256_v10 = vadd.f32 %v255_v1, %v253_v45  ;;  %v267_v11 = vmul.f32 %v266_v7, %v786_v50  ;;  %v269_v12 = vmul.f32 %v268_v8, %v794_v55  ;;  %s894_s15 = sld [smem:[#allocation2 + $0x51]]  ;;  %s896_s16 = sld [smem:[#allocation2 + $0x52]] }
  0x35   :  { %v271_v14 = vstv %s772_s17  ;;  %v274_v15 = vstv %s778_s18  ;;  %v283_v16 = vstv %s780_s19  ;;  %v277_v20 = vstv %s784_s20  ;;  %s902_s17 = sld [smem:[#allocation2 + $0x53]]  ;;  %s904_s18 = sld [smem:[#allocation2 + $0x55]] }
  0x36   :  { %v247_v13 = vadd.f32 %v246_v41, %v245_v9  ;;  %v259_v17 = vadd.f32 %v258_v5, %v256_v10  ;;  %v270_v18 = vadd.f32 %v269_v12, %v267_v11  ;;  %v272_v19 = vmul.f32 %v271_v14, %v820_v53  ;;  %s909_s19 = sld [smem:[#allocation2 + $0x4f]]  ;;  %s911_s20 = sld [smem:[#allocation2 + $0x56]] }
  0x37   :  { %v284_v21 = vmul.f32 %v283_v16, %v786_v50  ;;  %v285_v22 = vstv %s790_s21  ;;  %v288_v23 = vstv %s792_s22  ;;  %v280_v28 = vstv %s805_s25  ;;  %s916_s21 = sld [smem:[#allocation2 + $0x57]]  ;;  %s918_s22 = sld [smem:[#allocation2 + $0x58]] }
  0x38   :  { %v846_v24 = vmax.f32 %v247_v13, 0.0  ;;  %v262_v25 = vadd.f32 %v261_v6, %v259_v17  ;;  %v273_v26 = vadd.f32 %v272_v19, %v270_v18  ;;  %v286_v27 = vmul.f32 %v285_v22, %v794_v55  ;;  %s930_s25 = sld [smem:[#allocation2 + $0x5a]] }
  0x39   :  { %v289_v29 = vmul.f32 %v288_v23, %v820_v53  ;;  %v291_v30 = vstv %s798_s23  ;;  %v294_v31 = vstv %s803_s24  ;;  %v300_v36 = vstv %s810_s26  ;;  %s923_s23 = sld [smem:[#allocation2 + $0x54]]  ;;  %s928_s24 = sld [smem:[#allocation2 + $0x59]] }
  0x3a   :  { %v264_v32 = vadd.f32 %v263_v61, %v262_v25  ;;  %v275_v33 = vmul.f32 %v274_v15, %v846_v24  ;;  %v287_v34 = vadd.f32 %v286_v27, %v284_v21  ;;  %v292_v35 = vmul.f32 %v291_v30, %v846_v24  ;;  %s934_s26 = sld [smem:[#allocation2 + $0x5b]] }
  0x3b   :  { %v302_v37 = vstv %s812_s27  ;;  %v305_v38 = vstv %s816_s28  ;;  %v308_v39 = vstv %s818_s29  ;;  %v301_v44 = vmul.f32 %v300_v36, %v786_v50  ;;  %s938_s27 = sld [smem:[#allocation2 + $0x5c]]  ;;  %s940_s28 = sld [smem:[#allocation2 + $0x5d]] }
  0x3c   :  { %v867_v40 = vmax.f32 %v264_v32, 0.0  ;;  %v276_v42 = vadd.f32 %v275_v33, %v273_v26  ;;  %v290_v43 = vadd.f32 %v289_v29, %v287_v34  ;;  %v297_v46 = vstv %s829_s30  ;;  %s946_s29 = sld [smem:[#allocation2 + $0x5e]]  ;;  %s952_s30 = sld [smem:[#allocation2 + $0x60]] }
  0x3d   :  { %v303_v47 = vmul.f32 %v302_v37, %v794_v55  ;;  %v306_v48 = vmul.f32 %v305_v38, %v820_v53  ;;  %v311_v49 = vstv %s827_s0  ;;  %v309_v56 = vmul.f32 %v308_v39, %v846_v24  ;;  %s950_s0 = sld [smem:[#allocation2 + $0x5f]] }
  0x3e   :  { %v278_v51 = vmul.f32 %v277_v20, %v867_v40  ;;  %v293_v52 = vadd.f32 %v292_v35, %v290_v43  ;;  %v295_v54 = vmul.f32 %v294_v31, %v867_v40  ;;  %v312_v58 = vmul.f32 %v311_v49, %v867_v40 }
  0x3f   :  { %v304_v57 = vadd.f32 %v303_v47, %v301_v44  ;;  %v317_v59 = vstv %s836_s3  ;;  %v319_v60 = vstv %s838_s4  ;;  %v322_v3 = vstv %s844_s5  ;;  %s517_s3 = sld [smem:[#allocation2 + $0x61]]  ;;  %s561_s4 = smov [#allocation5]  }
  0x40   :  { %v279_v62 = vadd.f32 %v278_v51, %v276_v42  ;;  %v296_v63 = vadd.f32 %v295_v54, %v293_v52  ;;  %v318_v0 = vmul.f32 %v317_v59, %v786_v50  ;;  %v320_v1 = vmul.f32 %v319_v60, %v794_v55  ;;  %s409_s5 = sshll.u32 %s561_s4, 4  ;;  %s410_s5 = int_to_ptr.vmem [resolvable:$true] %s409_s5 }
  0x41   :  { %v307_v2 = vadd.f32 %v306_v48, %v304_v57  ;;  %v325_v4 = vstv %s849_s6  ;;  %v328_v41 = vstv %s851_s7  ;;  %v323_v7 = vmul.f32 %v322_v3, %v820_v53  ;;  %s534_s6 = scalar_lea.vmem %s410_s5, 48  ;;  %s538_s7 = scalar_lea.vmem %s410_s5, 64 }
  0x42   :  { %v281_v45 = vadd.f32 %v280_v28, %v279_v62  ;;  %v298_v5 = vadd.f32 %v297_v46, %v296_v63  ;;  %v321_v6 = vadd.f32 %v320_v1, %v318_v0  ;;  %v314_v9 = vstv %s859_s8  ;;  %p535_p3 = scmp.ne.s32.totalorder %s410_s5, %s534_s6  ;;  %p539_p4 = scmp.lt.s32.totalorder %s410_s5, %s410_s5 }
  0x43   :  { %v310_v8 = vadd.f32 %v309_v56, %v307_v2  ;;  %v326_v10 = vmul.f32 %v325_v4, %v846_v24  ;;  %v329_v11 = vmul.f32 %v328_v41, %v867_v40  ;;  %v334_v15 = vstv %s865_s9  ;;  %p540_p5 = scmp.lt.s32.totalorder %s538_s7, %s534_s6 }
  0x44   :  { %v282_v12 = vmax.f32 %v281_v45, 0.0  ;;  %v913_v61 = vmax.f32 %v298_v5, 0.0  ;;  %v324_v14 = vadd.f32 %v323_v7, %v321_v6  ;;  %v335_v13 = vmul.f32 %v334_v15, %v786_v50 }
  0x45   :  { %v313_v16 = vadd.f32 %v312_v58, %v310_v8  ;;  %v336_v17 = vstv %s870_s10  ;;  %v339_v18 = vstv %s872_s11  ;;  %v342_v22 = vstv %s878_s1  ;;  %p541_p6 = por %p540_p5, %p539_p4 }
  0x46   :  { %v327_v19 = vadd.f32 %v326_v10, %v324_v14  ;;  %v337_v20 = vmul.f32 %v336_v17, %v794_v55  ;;  %v340_v21 = vmul.f32 %v339_v18, %v820_v53  ;;  %v331_v25 = vstv %s885_s13 }
  0x47   :  { %v315_v23 = vadd.f32 %v314_v9, %v313_v16  ;;  %v345_v50 = vstv %s883_s12  ;;  %v343_v55 = vmul.f32 %v342_v22, %v846_v24  ;;  %v351_v28 = vstv %s890_s14  ;;  %p542_p7 = pnand %p541_p6, %p535_p3 }
  0x48   :  { %v330_v26 = vadd.f32 %v329_v11, %v327_v19  ;;  %v338_v27 = vadd.f32 %v337_v20, %v335_v13  ;;  %v352_v29 = vmul.f32 %v351_v28, %v282_v12  ;;  %v353_v30 = vstv %s894_s15 }
  0x49   :  { %v316_v53 = vmax.f32 %v315_v23, 0.0  ;;  %v356_v31 = vstv %s896_s16  ;;  %v346_v34 = vmul.f32 %v345_v50, %v867_v40  ;;  %v354_v35 = vmul.f32 %v353_v30, %v913_v61 }
  0x4a   :  { %v332_v32 = vadd.f32 %v331_v25, %v330_v26  ;;  %v341_v33 = vadd.f32 %v340_v21, %v338_v27  ;;  %v359_v36 = vstv %s902_s17  ;;  %v367_v37 = vstv %s904_s18 }
  0x4b   :  { %v357_v24 = vmul.f32 %v356_v31, %v316_v53  ;;  %v355_v42 = vadd.f32 %v354_v35, %v352_v29  ;;  %v368_v43 = vmul.f32 %v367_v37, %v282_v12  ;;  %v348_v44 = vstv %s909_s19 }
  0x4c   :  { %v333_v38 = vmax.f32 %v332_v32, 0.0  ;;  %v344_v39 = vadd.f32 %v343_v55, %v341_v33  ;;  %v369_v40 = vstv %s911_s20  ;;  %v372_v46 = vstv %s916_s21 }
  0x4d   :  { %v375_v47 = vstv %s918_s22  ;;  %v358_v49 = vadd.f32 %v357_v24, %v355_v42  ;;  %v370_v52 = vmul.f32 %v369_v40, %v913_v61  ;;  %v362_v54 = vstv %s923_s23 }
  0x4e   :  { %v347_v48 = vadd.f32 %v346_v34, %v344_v39  ;;  %v360_v51 = vmul.f32 %v359_v36, %v333_v38  ;;  %v373_v56 = vmul.f32 %v372_v46, %v316_v53  ;;  %v378_v57 = vstv %s928_s24 }
  0x4f   :  { %v383_v58 = vstv %s930_s25  ;;  %v371_v60 = vadd.f32 %v370_v52, %v368_v43  ;;  %v376_v62 = vmul.f32 %v375_v47, %v333_v38  ;;  %v385_v1 = vstv %s934_s26 }
  0x50   :  { %v349_v59 = vadd.f32 %v348_v44, %v347_v48  ;;  %v384_v63 = vmul.f32 %v383_v58, %v282_v12  ;;  %v361_v0 = vadd.f32 %v360_v51, %v358_v49  ;;  %v388_v2 = vstv %s938_s27 }
  0x51   :  { %v391_v3 = vstv %s940_s28  ;;  %v374_v41 = vadd.f32 %v373_v56, %v371_v60  ;;  %v386_v45 = vmul.f32 %v385_v1, %v913_v61  ;;  %v389_v5 = vmul.f32 %v388_v2, %v316_v53 }
  0x52   :  { %v350_v4 = vmax.f32 %v349_v59, 0.0  ;;  %v392_v6 = vmul.f32 %v391_v3, %v333_v38  ;;  %v394_v7 = vstv %s946_s29  ;;  %v365_v14 = vstv %s950_s0 }
  0x53   :  { %v377_v9 = vadd.f32 %v376_v62, %v374_v41  ;;  %v387_v11 = vadd.f32 %v386_v45, %v384_v63  ;;  %v381_v12 = vstv %s952_s30  ;;  %v397_v21 = vstv %s517_s3 }
  0x54   :  { %v363_v8 = vmul.f32 %v362_v54, %v350_v4  ;;  %v379_v10 = vmul.f32 %v378_v57, %v350_v4  ;;  %v395_v17 = vmul.f32 %v394_v7, %v350_v4 }
  0x55   :  { %v390_v13 = vadd.f32 %v389_v5, %v387_v11 }
  0x56   :  { %v364_v15 = vadd.f32 %v363_v8, %v361_v0  ;;  %v380_v16 = vadd.f32 %v379_v10, %v377_v9 }
  0x57   :  { %v393_v20 = vadd.f32 %v392_v6, %v390_v13 }
  0x58   :  { %v366_v18 = vadd.f32 %v365_v14, %v364_v15  ;;  %v382_v19 = vadd.f32 %v381_v12, %v380_v16 }
  0x59   :  { %v396_v61 = vadd.f32 %v395_v17, %v393_v20 }
  0x5a   :  { %399 = vst [vmem:[#allocation5] sm:$0x1] %v366_v18  ;;  %401 = vst [vmem:[#allocation5 + $0x1] sm:$0x1] %v382_v19 }
  0x5b   :  { %v398_v22 = vadd.f32 %v397_v21, %v396_v61 }
  0x5d   :  { %403 = vst [vmem:[#allocation5 + $0x2] sm:$0x1] %v398_v22 }
  0x5e   :  { %545 = shalt.err (!%p542_p7)
}
  0x5f   :  { %s546_s10 = scalar_lea.hbm %s983_s2, 48 }
  0x60   :  { %p547_p8 = scmp.ne.s32.totalorder %s983_s2, %s546_s10  ;;  %p550_p9 = scmp.lt.u32.totalorder %s546_s10, %s983_s2 }
  0x62   :  { %p552_p10 = pnand %p550_p9, %p547_p8 }
  0x64   :  { %555 = shalt.err (!%p552_p10)
}
  0x65   :  { %s562_s14 = smov 16   ;;  %s563_s15 = smov 1  }
  0x66   :  { %415 = dma.vmem_to_hbm [thread:$0]  %s410_s5, 48, %s983_s2, [#allocation3], %s562_s14, %s562_s14, %s563_s15  }
  0x67   :  { %558 = dma.done.wait [#allocation3], 48  }
  0x68   :  { %559 = vsyncadd [#allocation3], 4294967248 }
  0x69   :  { %419 = vsyncpa [#allocation3], 1 }
  0x6a   :  { %420 = vsyncpa [#allocation4], 1 }

</bundles_post_ra>
